<compile_context>
chip_gen: v7x
topology: tpu7x:2x2x1
jax: 0.10.0
libtpu: 0.0.40
codegen_flags: <defaults>
</compile_context>

<pallas_src>
import numpy as np
import jax
import jax.numpy as jnp
from jax import lax
from jax.experimental import pallas as pl
from jax.experimental.pallas import tpu as pltpu

# ---------------------------------------------------------------------------
# Model hyper-parameters (small shapes consistent with the module).
# ---------------------------------------------------------------------------
B = 2            # batch
C = 64           # in_channels (dim of the ConvNeXt block)
L = 16           # sequence length
OC = 48          # out_channels of the final 1x1 Conv1d projection
HIDDEN = 4 * C   # pwconv1 expansion
KSIZE = 7        # depthwise conv kernel size
PAD = 3          # depthwise conv padding
EPS = 1e-6       # LayerNorm eps
L2 = B * L       # both batches stacked along the sequence axis

# Row layout of the packed f32 parameter slab (PF_ROWS x C).
ROW_WDW = 0          # rows 0..6 : depthwise tap weights  wdw[k, c]
ROW_BDW = KSIZE      # row 7     : depthwise bias
ROW_GAMMA = 8        # row 8     : LayerNorm weight
ROW_BETA = 9         # row 9     : LayerNorm bias
ROW_WPT = 16         # rows 16..63 : projection weight Wp^T (OC, C)
PF_ROWS = ROW_WPT + OC   # 64

# Exact erf GELU == nn.GELU() default.  Set True to trade a tiny numerical
# deviation for moving the activation off the VALU onto the (idle) EUP.
USE_TANH_GELU = False

# dot_general dimension numbers: contract the LAST dim of both operands.
_NT = (((1,), (1,)), ((), ()))


def _gelu(x):
    if USE_TANH_GELU:
        return jax.nn.gelu(x, approximate=True)
    return 0.5 * x * (1.0 + lax.erf(x * 0.7071067811865476))


# ---------------------------------------------------------------------------
# Kernel
# ---------------------------------------------------------------------------
def decoder_kernel(x_ref,     # (B, C, L)                 f32  raw PyTorch NCL input
                   shb_ref,   # (KSIZE*L2 + OC, L2)       f32  stacked shift matrix + output-bias tile
                   pf_ref,    # (PF_ROWS, C)              f32  dwconv w/b, LN gamma/beta, Wp^T
                   b1_ref,    # (1, HIDDEN)               f32  pwconv1 bias
                   w_ref,     # (C + OC, HIDDEN)          bf16 [w1 ; (W2 Wp)^T]
                   out_ref):  # (B, OC, L)                f32  raw PyTorch NCL output
    # ---- hoisted single loads (everything is used exactly once) ------------
    shb = shb_ref[...]
    pf = pf_ref[...]
    b1 = b1_ref[...]
    w = w_ref[...]

    sh = shb[0:KSIZE * L2, :]                       # (224, 32) block-diag shift matrix
    bias_t = shb[KSIZE * L2:KSIZE * L2 + OC, :]     # (48, 32)  fused output bias tile
    bdw = pf[ROW_BDW:ROW_BDW + 1, :]                # (1, 64)
    gamma = pf[ROW_GAMMA:ROW_GAMMA + 1, :]          # (1, 64)
    beta = pf[ROW_BETA:ROW_BETA + 1, :]             # (1, 64)
    wpT = pf[ROW_WPT:ROW_WPT + OC, :].astype(jnp.bfloat16)   # (48, 64)
    w1 = w[0:C, :]                                  # (64, 256) bf16
    w2pT = w[C:C + OC, :]                           # (48, 256) bf16

    # ---- both batches gathered into one (C, 2L) channels-first slab --------
    x_both = jnp.concatenate([x_ref[0], x_ref[1]], axis=1)    # (64, 32) f32

    # ---- depthwise Conv1d(kernel=7, padding=3, groups=C) -------------------
    # ONE matmul for all 7 taps and both batches: row k*L2 + b*L + l of `r`
    # is x[b, :, l + k - PAD] (zero-padded), already in channels-last order.
    r = lax.dot_general(sh, x_both, _NT,
                        preferred_element_type=jnp.float32)   # (224, 64)
    acc = bdw + r[0:L2, :] * pf[ROW_WDW:ROW_WDW + 1, :]
    for k in range(1, KSIZE):                                 # 6 sublane-sliced FMAs
        acc = acc + r[k * L2:(k + 1) * L2, :] * pf[ROW_WDW + k:ROW_WDW + k + 1, :]
    # acc: (2L, C) = (32, 64), rows = [batch0 positions ; batch1 positions]

    # ---- LayerNorm over channels (channels_last), f32 statistics -----------
    u = jnp.mean(acc, axis=-1, keepdims=True)
    d = acc - u
    s = jnp.mean(d * d, axis=-1, keepdims=True)
    h = d * lax.rsqrt(s + EPS) * gamma + beta                 # (32, 64)

    # ---- pwconv1 -> GELU (bf16 MXU operands, f32 accumulate) ---------------
    h1 = jnp.dot(h.astype(jnp.bfloat16), w1,
                 preferred_element_type=jnp.float32) + b1     # (32, 256)
    g = _gelu(h1)

    # ---- fused [pwconv2 -> +residual -> 1x1 proj], output in NCL -----------
    #   out = Wp^T x  +  (W2 Wp)^T gelu(h1)  +  (Wp^T b2 + bp)
    out_both = (jnp.dot(wpT, x_both.astype(jnp.bfloat16),
                        preferred_element_type=jnp.float32)
                + lax.dot_general(w2pT, g.astype(jnp.bfloat16), _NT,
                                  preferred_element_type=jnp.float32)
                + bias_t)                                     # (48, 32)

    out_ref[0] = out_both[:, 0:L].astype(out_ref.dtype)
    out_ref[1] = out_both[:, L:2 * L].astype(out_ref.dtype)


def _full_spec(shape):
    n = len(shape)
    return pl.BlockSpec(shape, lambda i, _n=n: (0,) * _n)


@jax.jit
def decoder_forward(x_ncl, kparams):
    """x_ncl: (B, C, L) float32 (PyTorch NCL layout). Returns (B, OC, L)."""
    (shb, pf, b1, wslab) = kparams
    args = (x_ncl, shb, pf, b1, wslab)
    return pl.pallas_call(
        decoder_kernel,
        out_shape=jax.ShapeDtypeStruct((B, OC, L), jnp.float32),
        grid_spec=pltpu.PrefetchScalarGridSpec(
            num_scalar_prefetch=0,
            grid=(1,),                                   # collapsed single step
            in_specs=[_full_spec(a.shape) for a in args],
            out_specs=pl.BlockSpec((B, OC, L), lambda i: (0, 0, 0)),
        ),
        compiler_params=pltpu.CompilerParams(
            dimension_semantics=("arbitrary",)),
    )(*args)


# ---------------------------------------------------------------------------
# Parameters: PyTorch-shaped init + one-time host-side re-layout for the kernel.
# ---------------------------------------------------------------------------
def init_params(key):
    """Deterministic synthetic parameters with the PyTorch module's shapes."""
    ks = jax.random.split(key, 8)
    scale = 0.02
    dw_w = scale * jax.random.normal(ks[0], (C, 1, KSIZE), jnp.float32)   # dwconv.weight
    dw_b = scale * jax.random.normal(ks[1], (C,), jnp.float32)            # dwconv.bias
    ln_w = jnp.ones((C,), jnp.float32)                                    # norm.weight
    ln_b = jnp.zeros((C,), jnp.float32)                                   # norm.bias
    w1_t = scale * jax.random.normal(ks[2], (HIDDEN, C), jnp.float32)     # pwconv1.weight
    b1 = scale * jax.random.normal(ks[3], (HIDDEN,), jnp.float32)         # pwconv1.bias
    w2_t = scale * jax.random.normal(ks[4], (C, HIDDEN), jnp.float32)     # pwconv2.weight
    b2 = scale * jax.random.normal(ks[5], (C,), jnp.float32)              # pwconv2.bias
    wp_t = scale * jax.random.normal(ks[6], (OC, C, 1), jnp.float32)      # proj.weight
    bp = scale * jax.random.normal(ks[7], (OC,), jnp.float32)             # proj.bias
    return (dw_w, dw_b, ln_w, ln_b, w1_t, b1, w2_t, b2, wp_t, bp)


def prepare_params(torch_params):
    """One-time host-side weight re-layout / packing:
       * block-diagonal stacked shift matrix (KSIZE*2L, 2L) for the depthwise conv,
         concatenated with the fused output-bias tile broadcast to (OC, 2L)
       * f32 param slab (PF_ROWS, C): dwconv taps, dwconv bias, LN gamma/beta, Wp^T
       * pwconv1 bias as a (1, HIDDEN) row
       * bf16 weight slab (C+OC, HIDDEN): [w1 ; (W2 Wp)^T]  (pwconv2 + proj fused)
    """
    (dw_w, dw_b, ln_w, ln_b, w1_t, b1, w2_t, b2, wp_t, bp) = [
        np.asarray(p, np.float32) for p in torch_params]

    # Stacked block-diagonal shift matrix: one MXU matmul handles all taps + batches.
    sh = np.zeros((KSIZE * L2, L2), np.float32)
    for k in range(KSIZE):
        for b in range(B):
            for l in range(L):
                j = l + k - PAD
                if 0 <= j < L:
                    sh[k * L2 + b * L + l, b * L + j] = 1.0

    Wp = np.transpose(wp_t[:, :, 0])                              # (C, OC)
    bf = b2 @ Wp + bp                                             # (OC,)  == Wp^T b2 + bp
    bias_tile = np.broadcast_to(bf[:, None], (OC, L2)).astype(np.float32)
    shb = np.concatenate([sh, bias_tile], axis=0)                 # (224 + 48, 32)

    pf = np.zeros((PF_ROWS, C), np.float32)
    pf[ROW_WDW:ROW_WDW + KSIZE, :] = np.transpose(dw_w[:, 0, :])  # wdw[k, c]
    pf[ROW_BDW, :] = dw_b
    pf[ROW_GAMMA, :] = ln_w
    pf[ROW_BETA, :] = ln_b
    pf[ROW_WPT:ROW_WPT + OC, :] = wp_t[:, :, 0]                   # Wp^T (OC, C)

    b1r = b1.reshape(1, HIDDEN)

    w1 = np.transpose(w1_t)                                       # (C, HIDDEN)
    W2 = np.transpose(w2_t)                                       # (HIDDEN, C)
    w2pT = np.transpose(W2 @ Wp)                                  # (OC, HIDDEN)
    wslab = jnp.asarray(np.concatenate([w1, w2pT], axis=0)).astype(jnp.bfloat16)

    return (jnp.asarray(shb), jnp.asarray(pf), jnp.asarray(b1r), wslab)


def _reference_forward(x_ncl, torch_params):
    """Pure-jnp f32 reference with the exact PyTorch semantics (unfused)."""
    (dw_w, dw_b, ln_w, ln_b, w1_t, b1, w2_t, b2, wp_t, bp) = torch_params
    xp = jnp.pad(x_ncl, ((0, 0), (0, 0), (PAD, PAD)))
    conv = jnp.zeros((B, C, L), jnp.float32)
    for k in range(KSIZE):
        conv = conv + xp[:, :, k:k + L] * dw_w[None, :, 0, k, None]
    conv = conv + dw_b[None, :, None]
    h = jnp.transpose(conv, (0, 2, 1))                    # (B, L, C)
    u = jnp.mean(h, axis=-1, keepdims=True)
    v = jnp.mean((h - u) ** 2, axis=-1, keepdims=True)
    h = (h - u) / jnp.sqrt(v + EPS) * ln_w + ln_b
    h1 = h @ w1_t.T + b1
    h1 = 0.5 * h1 * (1.0 + lax.erf(h1 / jnp.sqrt(2.0)))
    h2 = h1 @ w2_t.T + b2
    y = x_ncl + jnp.transpose(h2, (0, 2, 1))              # residual, NCL
    out = jnp.einsum('oc,bcl->bol', wp_t[:, :, 0], y) + bp[None, :, None]
    return out


if __name__ == "__main__":
    key = jax.random.PRNGKey(0)
    k_x, k_p = jax.random.split(key)
    x = jax.random.normal(k_x, (B, C, L), jnp.float32)    # PyTorch NCL input
    torch_params = init_params(k_p)
    kparams = prepare_params(torch_params)

    out = decoder_forward(x, kparams)
    out = jax.block_until_ready(out)

    assert out.shape == (B, OC, L), out.shape
    assert bool(jnp.all(jnp.isfinite(out)))

    # Loose numerical check vs. the f32 reference (kernel uses bf16 MXU operands).
    ref = _reference_forward(x, torch_params)
    assert bool(jnp.allclose(out, ref, atol=2e-2, rtol=2e-2)), \
        float(jnp.max(jnp.abs(out - ref)))

    print("KERNEL_OK")
</pallas_src>

<mosaic_0001>
module attributes {stable_mosaic.version = 11 : i64} {
  func.func @decoder_kernel(%arg0: i32, %arg1: memref<2x64x16xf32, #tpu.memory_space<vmem>>, %arg2: memref<272x32xf32, #tpu.memory_space<vmem>>, %arg3: memref<64x64xf32, #tpu.memory_space<vmem>>, %arg4: memref<1x256xf32, #tpu.memory_space<vmem>>, %arg5: memref<112x256xbf16, #tpu.memory_space<vmem>>, %arg6: memref<2x48x16xf32, #tpu.memory_space<vmem>>) attributes {dimension_semantics = [#tpu.dimension_semantics<arbitrary>], iteration_bounds = array<i64: 1>, scalar_prefetch = 0 : i64, scratch_operands = 0 : i64, tpu.core_type = #tpu.core_type<tc>, window_params = [{pipeline_mode = #tpu.pipeline_mode<synchronous>, transform_indices = @transform_0, window_bounds = array<i64: 2, 64, 16>}, {pipeline_mode = #tpu.pipeline_mode<synchronous>, transform_indices = @transform_1, window_bounds = array<i64: 272, 32>}, {pipeline_mode = #tpu.pipeline_mode<synchronous>, transform_indices = @transform_2, window_bounds = array<i64: 64, 64>}, {pipeline_mode = #tpu.pipeline_mode<synchronous>, transform_indices = @transform_3, window_bounds = array<i64: 1, 256>}, {pipeline_mode = #tpu.pipeline_mode<synchronous>, transform_indices = @transform_4, window_bounds = array<i64: 112, 256>}, {pipeline_mode = #tpu.pipeline_mode<synchronous>, transform_indices = @transform_5, window_bounds = array<i64: 2, 48, 16>}]} {
    %c0 = arith.constant 0 : index
    %c0_0 = arith.constant 0 : index
    %0 = vector.load %arg2[%c0, %c0_0] : memref<272x32xf32, #tpu.memory_space<vmem>>, vector<272x32xf32>
    %c0_1 = arith.constant 0 : index
    %c0_2 = arith.constant 0 : index
    %1 = vector.load %arg3[%c0_1, %c0_2] : memref<64x64xf32, #tpu.memory_space<vmem>>, vector<64x64xf32>
    %c0_3 = arith.constant 0 : index
    %c0_4 = arith.constant 0 : index
    %2 = vector.load %arg4[%c0_3, %c0_4] : memref<1x256xf32, #tpu.memory_space<vmem>>, vector<1x256xf32>
    %c0_5 = arith.constant 0 : index
    %c0_6 = arith.constant 0 : index
    %3 = vector.load %arg5[%c0_5, %c0_6] : memref<112x256xbf16, #tpu.memory_space<vmem>>, vector<112x256xbf16>
    %4 = vector.extract_strided_slice %0 {offsets = [0, 0], sizes = [224, 32], strides = [1, 1]} : vector<272x32xf32> to vector<224x32xf32>
    %5 = vector.extract_strided_slice %0 {offsets = [224, 0], sizes = [48, 32], strides = [1, 1]} : vector<272x32xf32> to vector<48x32xf32>
    %6 = vector.extract_strided_slice %1 {offsets = [7, 0], sizes = [1, 64], strides = [1, 1]} : vector<64x64xf32> to vector<1x64xf32>
    %7 = vector.extract_strided_slice %1 {offsets = [8, 0], sizes = [1, 64], strides = [1, 1]} : vector<64x64xf32> to vector<1x64xf32>
    %8 = vector.extract_strided_slice %1 {offsets = [9, 0], sizes = [1, 64], strides = [1, 1]} : vector<64x64xf32> to vector<1x64xf32>
    %9 = vector.extract_strided_slice %1 {offsets = [16, 0], sizes = [48, 64], strides = [1, 1]} : vector<64x64xf32> to vector<48x64xf32>
    %10 = arith.truncf %9 : vector<48x64xf32> to vector<48x64xbf16>
    %11 = vector.extract_strided_slice %3 {offsets = [0, 0], sizes = [64, 256], strides = [1, 1]} : vector<112x256xbf16> to vector<64x256xbf16>
    %12 = vector.extract_strided_slice %3 {offsets = [64, 0], sizes = [48, 256], strides = [1, 1]} : vector<112x256xbf16> to vector<48x256xbf16>
    %c0_7 = arith.constant 0 : index
    %c0_8 = arith.constant 0 : index
    %c0_9 = arith.constant 0 : index
    %13 = vector.load %arg1[%c0_7, %c0_8, %c0_9] : memref<2x64x16xf32, #tpu.memory_space<vmem>>, vector<1x64x16xf32>
    %14 = vector.shape_cast %13 : vector<1x64x16xf32> to vector<64x16xf32>
    %c1 = arith.constant 1 : index
    %c0_10 = arith.constant 0 : index
    %c0_11 = arith.constant 0 : index
    %15 = vector.load %arg1[%c1, %c0_10, %c0_11] : memref<2x64x16xf32, #tpu.memory_space<vmem>>, vector<1x64x16xf32>
    %16 = vector.shape_cast %15 : vector<1x64x16xf32> to vector<64x16xf32>
    %17 = tpu.concatenate %14, %16 in 1 : vector<64x16xf32>, vector<64x16xf32> -> vector<64x32xf32>
    %cst = arith.constant dense<0.000000e+00> : vector<224x64xf32>
    %18 = tpu.matmul %4, %17, %cst {dimension_numbers = #tpu.dot_dimension_numbers<[1], [1], [0], [0], [0, 0, 1, 0], [], []>} : vector<224x32xf32>, vector<64x32xf32>, vector<224x64xf32> -> vector<224x64xf32>
    %19 = vector.extract_strided_slice %18 {offsets = [0, 0], sizes = [32, 64], strides = [1, 1]} : vector<224x64xf32> to vector<32x64xf32>
    %20 = vector.extract_strided_slice %1 {offsets = [0, 0], sizes = [1, 64], strides = [1, 1]} : vector<64x64xf32> to vector<1x64xf32>
    %21 = vector.broadcast %20 : vector<1x64xf32> to vector<32x64xf32>
    %22 = arith.mulf %19, %21 : vector<32x64xf32>
    %23 = vector.broadcast %6 : vector<1x64xf32> to vector<32x64xf32>
    %24 = arith.addf %23, %22 : vector<32x64xf32>
    %25 = vector.extract_strided_slice %18 {offsets = [32, 0], sizes = [32, 64], strides = [1, 1]} : vector<224x64xf32> to vector<32x64xf32>
    %26 = vector.extract_strided_slice %1 {offsets = [1, 0], sizes = [1, 64], strides = [1, 1]} : vector<64x64xf32> to vector<1x64xf32>
    %27 = vector.broadcast %26 : vector<1x64xf32> to vector<32x64xf32>
    %28 = arith.mulf %25, %27 : vector<32x64xf32>
    %29 = arith.addf %24, %28 : vector<32x64xf32>
    %30 = vector.extract_strided_slice %18 {offsets = [64, 0], sizes = [32, 64], strides = [1, 1]} : vector<224x64xf32> to vector<32x64xf32>
    %31 = vector.extract_strided_slice %1 {offsets = [2, 0], sizes = [1, 64], strides = [1, 1]} : vector<64x64xf32> to vector<1x64xf32>
    %32 = vector.broadcast %31 : vector<1x64xf32> to vector<32x64xf32>
    %33 = arith.mulf %30, %32 : vector<32x64xf32>
    %34 = arith.addf %29, %33 : vector<32x64xf32>
    %35 = vector.extract_strided_slice %18 {offsets = [96, 0], sizes = [32, 64], strides = [1, 1]} : vector<224x64xf32> to vector<32x64xf32>
    %36 = vector.extract_strided_slice %1 {offsets = [3, 0], sizes = [1, 64], strides = [1, 1]} : vector<64x64xf32> to vector<1x64xf32>
    %37 = vector.broadcast %36 : vector<1x64xf32> to vector<32x64xf32>
    %38 = arith.mulf %35, %37 : vector<32x64xf32>
    %39 = arith.addf %34, %38 : vector<32x64xf32>
    %40 = vector.extract_strided_slice %18 {offsets = [128, 0], sizes = [32, 64], strides = [1, 1]} : vector<224x64xf32> to vector<32x64xf32>
    %41 = vector.extract_strided_slice %1 {offsets = [4, 0], sizes = [1, 64], strides = [1, 1]} : vector<64x64xf32> to vector<1x64xf32>
    %42 = vector.broadcast %41 : vector<1x64xf32> to vector<32x64xf32>
    %43 = arith.mulf %40, %42 : vector<32x64xf32>
    %44 = arith.addf %39, %43 : vector<32x64xf32>
    %45 = vector.extract_strided_slice %18 {offsets = [160, 0], sizes = [32, 64], strides = [1, 1]} : vector<224x64xf32> to vector<32x64xf32>
    %46 = vector.extract_strided_slice %1 {offsets = [5, 0], sizes = [1, 64], strides = [1, 1]} : vector<64x64xf32> to vector<1x64xf32>
    %47 = vector.broadcast %46 : vector<1x64xf32> to vector<32x64xf32>
    %48 = arith.mulf %45, %47 : vector<32x64xf32>
    %49 = arith.addf %44, %48 : vector<32x64xf32>
    %50 = vector.extract_strided_slice %18 {offsets = [192, 0], sizes = [32, 64], strides = [1, 1]} : vector<224x64xf32> to vector<32x64xf32>
    %51 = vector.extract_strided_slice %1 {offsets = [6, 0], sizes = [1, 64], strides = [1, 1]} : vector<64x64xf32> to vector<1x64xf32>
    %52 = vector.broadcast %51 : vector<1x64xf32> to vector<32x64xf32>
    %53 = arith.mulf %50, %52 : vector<32x64xf32>
    %54 = arith.addf %49, %53 : vector<32x64xf32>
    %cst_12 = arith.constant dense<0.000000e+00> : vector<32xf32>
    %55 = vector.multi_reduction <add>, %54, %cst_12 [1] : vector<32x64xf32> to vector<32xf32>
    %56 = vector.shape_cast %55 : vector<32xf32> to vector<32x1xf32>
    %cst_13 = arith.constant 6.400000e+01 : f32
    %57 = vector.broadcast %cst_13 : f32 to vector<32x1xf32>
    %58 = arith.divf %56, %57 : vector<32x1xf32>
    %59 = vector.broadcast %58 : vector<32x1xf32> to vector<32x64xf32>
    %60 = arith.subf %54, %59 : vector<32x64xf32>
    %61 = arith.mulf %60, %60 : vector<32x64xf32>
    %cst_14 = arith.constant dense<0.000000e+00> : vector<32xf32>
    %62 = vector.multi_reduction <add>, %61, %cst_14 [1] : vector<32x64xf32> to vector<32xf32>
    %63 = vector.shape_cast %62 : vector<32xf32> to vector<32x1xf32>
    %cst_15 = arith.constant 6.400000e+01 : f32
    %64 = vector.broadcast %cst_15 : f32 to vector<32x1xf32>
    %65 = arith.divf %63, %64 : vector<32x1xf32>
    %cst_16 = arith.constant 9.99999997E-7 : f32
    %66 = vector.broadcast %cst_16 : f32 to vector<32x1xf32>
    %67 = arith.addf %65, %66 : vector<32x1xf32>
    %68 = math.rsqrt %67 : vector<32x1xf32>
    %69 = vector.broadcast %68 : vector<32x1xf32> to vector<32x64xf32>
    %70 = arith.mulf %60, %69 : vector<32x64xf32>
    %71 = vector.broadcast %7 : vector<1x64xf32> to vector<32x64xf32>
    %72 = arith.mulf %70, %71 : vector<32x64xf32>
    %73 = vector.broadcast %8 : vector<1x64xf32> to vector<32x64xf32>
    %74 = arith.addf %72, %73 : vector<32x64xf32>
    %75 = arith.truncf %74 : vector<32x64xf32> to vector<32x64xbf16>
    %cst_17 = arith.constant dense<0.000000e+00> : vector<32x256xf32>
    %76 = tpu.matmul %75, %11, %cst_17 {dimension_numbers = #tpu.dot_dimension_numbers<[1], [0], [0], [1], [0, 0, 1, 1], [], []>} : vector<32x64xbf16>, vector<64x256xbf16>, vector<32x256xf32> -> vector<32x256xf32>
    %77 = vector.broadcast %2 : vector<1x256xf32> to vector<32x256xf32>
    %78 = arith.addf %76, %77 : vector<32x256xf32>
    %cst_18 = arith.constant 5.000000e-01 : f32
    %79 = vector.broadcast %cst_18 : f32 to vector<32x256xf32>
    %80 = arith.mulf %79, %78 : vector<32x256xf32>
    %cst_19 = arith.constant 0.707106769 : f32
    %81 = vector.broadcast %cst_19 : f32 to vector<32x256xf32>
    %82 = arith.mulf %78, %81 : vector<32x256xf32>
    %83 = math.erf %82 : vector<32x256xf32>
    %cst_20 = arith.constant 1.000000e+00 : f32
    %84 = vector.broadcast %cst_20 : f32 to vector<32x256xf32>
    %85 = arith.addf %84, %83 : vector<32x256xf32>
    %86 = arith.mulf %80, %85 : vector<32x256xf32>
    %87 = arith.truncf %17 : vector<64x32xf32> to vector<64x32xbf16>
    %cst_21 = arith.constant dense<0.000000e+00> : vector<48x32xf32>
    %88 = tpu.matmul %10, %87, %cst_21 {dimension_numbers = #tpu.dot_dimension_numbers<[1], [0], [0], [1], [0, 0, 1, 1], [], []>} : vector<48x64xbf16>, vector<64x32xbf16>, vector<48x32xf32> -> vector<48x32xf32>
    %89 = arith.truncf %86 : vector<32x256xf32> to vector<32x256xbf16>
    %cst_22 = arith.constant dense<0.000000e+00> : vector<48x32xf32>
    %90 = tpu.matmul %12, %89, %cst_22 {dimension_numbers = #tpu.dot_dimension_numbers<[1], [1], [0], [0], [0, 0, 1, 0], [], []>} : vector<48x256xbf16>, vector<32x256xbf16>, vector<48x32xf32> -> vector<48x32xf32>
    %91 = arith.addf %88, %90 : vector<48x32xf32>
    %92 = arith.addf %91, %5 : vector<48x32xf32>
    %93 = vector.extract_strided_slice %92 {offsets = [0, 0], sizes = [48, 16], strides = [1, 1]} : vector<48x32xf32> to vector<48x16xf32>
    %c0_23 = arith.constant 0 : index
    %c0_24 = arith.constant 0 : index
    %c0_25 = arith.constant 0 : index
    %94 = vector.load %arg6[%c0_23, %c0_24, %c0_25] : memref<2x48x16xf32, #tpu.memory_space<vmem>>, vector<1x48x16xf32>
    %95 = vector.shape_cast %94 : vector<1x48x16xf32> to vector<48x16xf32>
    %96 = vector.shape_cast %93 : vector<48x16xf32> to vector<1x48x16xf32>
    tpu.vector_store %arg6[%c0_23, %c0_24, %c0_25], %96 {strides = array<i32>} : memref<2x48x16xf32, #tpu.memory_space<vmem>>, vector<1x48x16xf32>,
    %97 = vector.extract_strided_slice %92 {offsets = [0, 16], sizes = [48, 16], strides = [1, 1]} : vector<48x32xf32> to vector<48x16xf32>
    %c1_26 = arith.constant 1 : index
    %c0_27 = arith.constant 0 : index
    %c0_28 = arith.constant 0 : index
    %98 = vector.load %arg6[%c1_26, %c0_27, %c0_28] : memref<2x48x16xf32, #tpu.memory_space<vmem>>, vector<1x48x16xf32>
    %99 = vector.shape_cast %98 : vector<1x48x16xf32> to vector<48x16xf32>
    %100 = vector.shape_cast %97 : vector<48x16xf32> to vector<1x48x16xf32>
    tpu.vector_store %arg6[%c1_26, %c0_27, %c0_28], %100 {strides = array<i32>} : memref<2x48x16xf32, #tpu.memory_space<vmem>>, vector<1x48x16xf32>,
    return
  }
  func.func @transform_0(%arg0: i32) -> (i32, i32, i32) {
    %c0_i32 = arith.constant 0 : i32
    %c0_i32_0 = arith.constant 0 : i32
    %c0_i32_1 = arith.constant 0 : i32
    %c0_i32_2 = arith.constant 0 : i32
    return %c0_i32, %c0_i32_0, %c0_i32_1 : i32, i32, i32
  }
  func.func @transform_1(%arg0: i32) -> (i32, i32) {
    %c0_i32 = arith.constant 0 : i32
    %c0_i32_0 = arith.constant 0 : i32
    %c0_i32_1 = arith.constant 0 : i32
    return %c0_i32, %c0_i32_0 : i32, i32
  }
  func.func @transform_2(%arg0: i32) -> (i32, i32) {
    %c0_i32 = arith.constant 0 : i32
    %c0_i32_0 = arith.constant 0 : i32
    %c0_i32_1 = arith.constant 0 : i32
    return %c0_i32, %c0_i32_0 : i32, i32
  }
  func.func @transform_3(%arg0: i32) -> (i32, i32) {
    %c0_i32 = arith.constant 0 : i32
    %c0_i32_0 = arith.constant 0 : i32
    %c0_i32_1 = arith.constant 0 : i32
    return %c0_i32, %c0_i32_0 : i32, i32
  }
  func.func @transform_4(%arg0: i32) -> (i32, i32) {
    %c0_i32 = arith.constant 0 : i32
    %c0_i32_0 = arith.constant 0 : i32
    %c0_i32_1 = arith.constant 0 : i32
    return %c0_i32, %c0_i32_0 : i32, i32
  }
  func.func @transform_5(%arg0: i32) -> (i32, i32, i32) {
    %c0_i32 = arith.constant 0 : i32
    %c0_i32_0 = arith.constant 0 : i32
    %c0_i32_1 = arith.constant 0 : i32
    %c0_i32_2 = arith.constant 0 : i32
    return %c0_i32, %c0_i32_0, %c0_i32_1 : i32, i32, i32
  }
}

</mosaic_0001>

<bundles_post_ra>
// kernel: decoder_forward.1
= control target key start
LH: loop header
LB: loop body
LE: loop exit
PB: predicated region body
PF: predicated region fallthrough
CT: control target
= control target key end

     0   :  { %s1255_s9 = smov 16   ;;  %vm139_vm0 = vcmask 261120   ;;  %vm130_vm1 = vcmask 130048   ;;  %vm541_vm3 = vcmask 523264   ;;  %vm1258_vm4 = vmmov 0   ;;  %s1259_s27 = smov 112   ;;  %s1684_s0 = inlined_call_operand.vmem [shape: f32[2,64,16], index: 0, kind: input, shape index: {}]   ;;  %s1685_s1 = inlined_call_operand.vmem [shape: f32[272,32], index: 1, kind: input, shape index: {}]   ;;  %s1686_s2 = inlined_call_operand.vmem [shape: f32[64,64], index: 2, kind: input, shape index: {}]   ;;  %s1687_s4 = inlined_call_operand.vmem [shape: bf16[112,256], index: 4, kind: input, shape index: {}]   ;;  %s1688_s3 = inlined_call_operand.vmem [shape: f32[1,256], index: 3, kind: input, shape index: {}]   ;;  %s1689_s5 = inlined_call_operand.vmem [shape: f32[2,48,16], index: 5, kind: output, shape index: {}]  }
   0x1   :  { %v971_v0 = vld [vmem:[%s1684_s0 + $0x40] sm:$0xff]  ;;  %v972_v1 = vld [vmem:[%s1684_s0 + $0x48] sm:$0xff]  ;;  %v973_v2 = vld [vmem:[%s1684_s0 + $0x50] sm:$0xff] }
   0x2   :  { %v1190_v3 = vpack.i.bf16 %v972_v1, %v971_v0  ;;  %v974_v4 = vld [vmem:[%s1684_s0 + $0x58] sm:$0xff]  ;;  %v975_v5 = vld [vmem:[%s1684_s0 + $0x60] sm:$0xff]  ;;  %v976_v6 = vld [vmem:[%s1684_s0 + $0x68] sm:$0xff] }
   0x3   :  { %v1200_v7 = vpack.i.bf16 %v976_v6, %v975_v5  ;;  %v977_v8 = vld [vmem:[%s1684_s0 + $0x70] sm:$0xff]  ;;  %v978_v9 = vld [vmem:[%s1684_s0 + $0x78] sm:$0xff]  ;;  %v1195_v10 = vpack.i.bf16 %v974_v4, %v973_v2  ;;  %v21_v12 = vld [vmem:[%s1685_s1] sm:$0xff] }
   0x4   :  { %1191 = vrot.lane.b32.xlu0 %v1190_v3, %s1255_s9  ;;  %v1205_v11 = vpack.i.bf16 %v978_v9, %v977_v8  ;;  %1099 = vmatprep.mubr.msk.f32.mxu0 %vm139_vm0, %v21_v12  ;;  %v81_v14 = vld [vmem:[%s1684_s0] sm:$0xff]  ;;  %v82_v15 = vld [vmem:[%s1684_s0 + $0x8] sm:$0xff]  ;;  %vm1328_vm2 = vmpackc.low %vm139_vm0, %vm139_vm0  ;;  %v453_v9 = vlaneseq }
   0x5   :  { %1201 = vrot.lane.b32.xlu1 %v1200_v7, %s1255_s9  ;;  %v83_v24 = vld [vmem:[%s1684_s0 + $0x10] sm:$0xff]  ;;  %v84_v25 = vld [vmem:[%s1684_s0 + $0x18] sm:$0xff]  ;;  %v85_v30 = vld [vmem:[%s1684_s0 + $0x20] sm:$0xff] }
   0x6   :  { %v86_v31 = vld [vmem:[%s1684_s0 + $0x28] sm:$0xff]  ;;  %v87_v41 = vld [vmem:[%s1684_s0 + $0x30] sm:$0xff]  ;;  %v88_v42 = vld [vmem:[%s1684_s0 + $0x38] sm:$0xff] }
   0x7   :  { %v22_v46 = vld [vmem:[%s1685_s1 + $0x8] sm:$0xff]  ;;  %v23_v47 = vld [vmem:[%s1685_s1 + $0x10] sm:$0xff]  ;;  %v24_v48 = vld [vmem:[%s1685_s1 + $0x18] sm:$0xff] }
   0x8   :  { %1196 = vrot.lane.b32.xlu0 %v1195_v10, %s1255_s9  ;;  %v25_v49 = vld [vmem:[%s1685_s1 + $0x20] sm:$0xff]  ;;  %v26_v50 = vld [vmem:[%s1685_s1 + $0x28] sm:$0xff]  ;;  %v27_v51 = vld [vmem:[%s1685_s1 + $0x30] sm:$0xff]  ;;  %v1496_v10 = vshrl.u32 %v453_v9, 7 }
   0x9   :  { %1206 = vrot.lane.b32.xlu1 %v1205_v11, %s1255_s9  ;;  %v28_v52 = vld [vmem:[%s1685_s1 + $0x38] sm:$0xff]  ;;  %v29_v53 = vld [vmem:[%s1685_s1 + $0x40] sm:$0xff]  ;;  %v30_v54 = vld [vmem:[%s1685_s1 + $0x48] sm:$0xff] }
   0xa   :  { %v31_v55 = vld [vmem:[%s1685_s1 + $0x50] sm:$0xff]  ;;  %v32_v56 = vld [vmem:[%s1685_s1 + $0x58] sm:$0xff]  ;;  %v33_v57 = vld [vmem:[%s1685_s1 + $0x60] sm:$0xff]  ;;  %v1499_v11 = vsub.s32 0, %v1496_v10 }
   0xb   :  { %v34_v58 = vld [vmem:[%s1685_s1 + $0x68] sm:$0xff]  ;;  %v35_v59 = vld [vmem:[%s1685_s1 + $0x70] sm:$0xff]  ;;  %v36_v60 = vld [vmem:[%s1685_s1 + $0x78] sm:$0xff] }
   0xc   :  { %v37_v61 = vld [vmem:[%s1685_s1 + $0x80] sm:$0xff]  ;;  %v38_v62 = vld [vmem:[%s1685_s1 + $0x88] sm:$0xff]  ;;  %v39_v63 = vld [vmem:[%s1685_s1 + $0x90] sm:$0xff] }
   0xd   :  { %v40_v0 = vld [vmem:[%s1685_s1 + $0x98] sm:$0xff]  ;;  %v41_v1 = vld [vmem:[%s1685_s1 + $0xa0] sm:$0xff]  ;;  %v42_v2 = vld [vmem:[%s1685_s1 + $0xa8] sm:$0xff] }
   0xe   :  { %v43_v3 = vld [vmem:[%s1685_s1 + $0xb0] sm:$0xff]  ;;  %v44_v4 = vld [vmem:[%s1685_s1 + $0xb8] sm:$0xff]  ;;  %v45_v5 = vld [vmem:[%s1685_s1 + $0xc0] sm:$0xff] }
   0xf   :  { %v46_v6 = vld [vmem:[%s1685_s1 + $0xc8] sm:$0xff]  ;;  %v47_v7 = vld [vmem:[%s1685_s1 + $0xd0] sm:$0xff]  ;;  %v48_v8 = vld [vmem:[%s1685_s1 + $0xd8] sm:$0xff] }
  0x10   :  { %v1504_v12 = vld [vmem:[%s1686_s2] sm:$0xff] }
  0x76   :  { %v1192_v13 = vpop.permute.xlu0 %1191 }
  0x77   :  { %v1194_v16 = vunpack.i.h.bf16 %v1192_v13  ;;  %v1193_v17 = vunpack.i.l.bf16 %v1192_v13  ;;  %v1202_v18 = vpop.permute.xlu1 %1201 }
  0x78   :  { %v1204_v28 = vunpack.i.h.bf16 %v1202_v18  ;;  %v1203_v29 = vunpack.i.l.bf16 %v1202_v18 }
  0x79   :  { %v131_v19 = vsel %vm130_vm1, %v81_v14, %v1193_v17  ;;  %v132_v20 = vsel %vm130_vm1, %v82_v15, %v1194_v16  ;;  %v456_v14 = vrot.slane %v1504_v12, %v1499_v11  ;;  %v463_v15 = vsub.s32 7, %v1496_v10 }
  0x7a   :  { %v1332_v22 = vpack.c.bf16 %v132_v20, %v131_v19  ;;  %v1197_v23 = vpop.permute.xlu0 %1196  ;;  %v135_v35 = vsel %vm130_vm1, %v85_v30, %v1203_v29  ;;  %v136_v36 = vsel %vm130_vm1, %v86_v31, %v1204_v28  ;;  %v1510_v17 = vsub.s32 1, %v1496_v10 }
  0x7b   :  { %v1199_v26 = vunpack.i.h.bf16 %v1197_v23  ;;  %v1198_v27 = vunpack.i.l.bf16 %v1197_v23  ;;  %v1207_v37 = vpop.permute.xlu1 %1206  ;;  %v1361_v38 = vpack.c.bf16 %v136_v36, %v135_v35  ;;  %v464_v20 = vrot.slane %v1504_v12, %v463_v15 }
  0x7c   :  { %1163 = vmatprep.subr.msk.bf16.mxu0 %vm1328_vm2, %v1332_v22  ;;  %v1209_v39 = vunpack.i.h.bf16 %v1207_v37  ;;  %v1208_v40 = vunpack.i.l.bf16 %v1207_v37  ;;  %v472_v23 = vrot.slane %v1504_v12, %v1510_v17  ;;  %v483_v30 = vsub.s32 2, %v1496_v10 }
  0x7d   :  { %1166 = vmatpush3.bf16.xpose.msk.msra.mxu0 %vm1328_vm2, %v1332_v22  ;;  %v133_v32 = vsel %vm130_vm1, %v83_v24, %v1198_v27  ;;  %v134_v33 = vsel %vm130_vm1, %v84_v25, %v1199_v26 }
  0x7e   :  { %v1354_v34 = vpack.c.bf16 %v134_v33, %v133_v32  ;;  %v137_v43 = vsel %vm130_vm1, %v87_v41, %v1208_v40  ;;  %v138_v44 = vsel %vm130_vm1, %v88_v42, %v1209_v39  ;;  %v484_v42 = vrot.slane %v1504_v12, %v483_v30 }
  0x7f   :  { %v1377_v45 = vpack.c.bf16 %v138_v44, %v137_v43 }
  0x80   :  { %1169 = vmatprep.subr.msk.bf16.mxu0 %vm1328_vm2, %v1354_v34 }
  0x85   :  { %1172 = vmatpush3.bf16.xpose.msk.msra.mxu0 %vm1328_vm2, %v1354_v34 }
  0x86   :  { %1175 = vmatprep.subr.msk.bf16.mxu0 %vm1328_vm2, %v1361_v38 }
  0x8d   :  { %1178 = vmatpush3.bf16.xpose.msk.msra.mxu0 %vm1328_vm2, %v1361_v38 }
  0x8e   :  { %1181 = vmatprep.subr.msk.bf16.mxu0 %vm1328_vm2, %v1377_v45 }
  0x95   :  { %1184 = vmatpush3.bf16.xpose.msk.msra.mxu0 %vm1328_vm2, %v1377_v45 }
  0x9c   :  { %1100 = vmatmul.mubr.msk.f32.vlgmr.msra.gmra.mrb[0].mxu0 %vm139_vm0, %v22_v46 }
  0x9d   :  { %1102 = vmatprep.mubr.msk.f32.mxu0 %vm139_vm0, %v23_v47 }
  0xa0   :  { %1103 = vmatmul.mubr.msk.f32.gmra.mrb[2].mxu0 %vm139_vm0, %v24_v48 }
  0xa1   :  { %1105 = vmatprep.mubr.msk.f32.mxu0 %vm139_vm0, %v25_v49 }
  0xa4   :  { %1106 = vmatmul.mubr.msk.f32.gmra.mrb[4].mxu0 %vm139_vm0, %v26_v50 }
  0xa5   :  { %1108 = vmatprep.mubr.msk.f32.mxu0 %vm139_vm0, %v27_v51  ;;  %v495_v51 = vsub.s32 3, %v1496_v10 }
  0xa8   :  { %1109 = vmatmul.mubr.msk.f32.gmra.mrb[6].mxu0 %vm139_vm0, %v28_v52 }
  0xa9   :  { %1111 = vmatprep.mubr.msk.f32.mxu0 %vm139_vm0, %v29_v53 }
  0xac   :  { %1112 = vmatmul.mubr.msk.f32.gmra.mrb[8].mxu0 %vm139_vm0, %v30_v54 }
  0xad   :  { %1114 = vmatprep.mubr.msk.f32.mxu0 %vm139_vm0, %v31_v55 }
  0xb0   :  { %1115 = vmatmul.mubr.msk.f32.gmra.mrb[10].mxu0 %vm139_vm0, %v32_v56 }
  0xb1   :  { %1117 = vmatprep.mubr.msk.f32.mxu0 %vm139_vm0, %v33_v57 }
  0xb4   :  { %1118 = vmatmul.mubr.msk.f32.gmra.mrb[12].mxu0 %vm139_vm0, %v34_v58  ;;  %v496_v58 = vrot.slane %v1504_v12, %v495_v51 }
  0xb5   :  { %1120 = vmatprep.mubr.msk.f32.mxu0 %vm139_vm0, %v35_v59 }
  0xb8   :  { %1121 = vmatmul.mubr.msk.f32.gmra.mrb[14].mxu0 %vm139_vm0, %v36_v60 }
  0xb9   :  { %1123 = vmatprep.mubr.msk.f32.mxu0 %vm139_vm0, %v37_v61 }
  0xbc   :  { %1124 = vmatmul.mubr.msk.f32.gmra.mrb[16].mxu0 %vm139_vm0, %v38_v62 }
  0xbd   :  { %1126 = vmatprep.mubr.msk.f32.mxu0 %vm139_vm0, %v39_v63 }
  0xc0   :  { %1127 = vmatmul.mubr.msk.f32.gmra.mrb[18].mxu0 %vm139_vm0, %v40_v0 }
  0xc1   :  { %1129 = vmatprep.mubr.msk.f32.mxu0 %vm139_vm0, %v41_v1  ;;  %v507_v1 = vsub.s32 4, %v1496_v10 }
  0xc4   :  { %1130 = vmatmul.mubr.msk.f32.gmra.mrb[20].mxu0 %vm139_vm0, %v42_v2 }
  0xc5   :  { %1132 = vmatprep.mubr.msk.f32.mxu0 %vm139_vm0, %v43_v3 }
  0xc8   :  { %1133 = vmatmul.mubr.msk.f32.gmra.mrb[22].mxu0 %vm139_vm0, %v44_v4 }
  0xc9   :  { %1135 = vmatprep.mubr.msk.f32.mxu0 %vm139_vm0, %v45_v5 }
  0xcc   :  { %1136 = vmatmul.mubr.msk.f32.gmra.mrb[24].mxu0 %vm139_vm0, %v46_v6 }
  0xcd   :  { %1138 = vmatprep.mubr.msk.f32.mxu0 %vm139_vm0, %v47_v7 }
  0xd0   :  { %1139 = vmatmul.mubr.msk.f32.gmra.mrb[26].mxu0 %vm139_vm0, %v48_v8  ;;  %v508_v8 = vrot.slane %v1504_v12, %v507_v1 }
 0x16f   :  { %v1101_v13 = vpop.f32.mrb[0].mxu0 }
 0x170   :  { %v314_v16 = vpop.f32.mrb[1].mxu0  ;;  %v458_v19 = vmul.f32 %v1101_v13, %v456_v14 }
 0x171   :  { %v457_v24 = vmul.f32 %v456_v14, %v314_v16 }
 0x172   :  { %v466_v26 = vadd.f32 %v464_v20, %v458_v19  ;;  %v519_v19 = vsub.s32 5, %v1496_v10 }
 0x173   :  { %v1104_v18 = vpop.f32.mrb[2].mxu0  ;;  %v465_v31 = vadd.f32 %v464_v20, %v457_v24 }
 0x174   :  { %v324_v21 = vpop.f32.mrb[3].mxu0  ;;  %v460_v27 = vmul.f32 %v1104_v18, %v456_v14 }
 0x175   :  { %v459_v32 = vmul.f32 %v456_v14, %v324_v21 }
 0x176   :  { %v468_v39 = vadd.f32 %v464_v20, %v460_v27  ;;  %v520_v27 = vrot.slane %v1504_v12, %v519_v19 }
 0x177   :  { %v1107_v25 = vpop.f32.mrb[4].mxu0  ;;  %v467_v43 = vadd.f32 %v464_v20, %v459_v32 }
 0x178   :  { %v474_v28 = vmul.f32 %v1107_v25, %v472_v23  ;;  %v334_v29 = vpop.f32.mrb[5].mxu0 }
 0x179   :  { %v473_v33 = vmul.f32 %v472_v23, %v334_v29 }
 0x17a   :  { %v478_v35 = vadd.f32 %v474_v28, %v466_v26 }
 0x17b   :  { %v477_v36 = vadd.f32 %v473_v33, %v465_v31  ;;  %v1110_v37 = vpop.f32.mrb[6].mxu0 }
 0x17c   :  { %v476_v40 = vmul.f32 %v1110_v37, %v472_v23  ;;  %v344_v41 = vpop.f32.mrb[7].mxu0 }
 0x17d   :  { %v475_v44 = vmul.f32 %v472_v23, %v344_v41 }
 0x17e   :  { %v480_v46 = vadd.f32 %v476_v40, %v468_v39 }
 0x17f   :  { %v479_v47 = vadd.f32 %v475_v44, %v467_v43  ;;  %v1113_v48 = vpop.f32.mrb[8].mxu0 }
 0x180   :  { %v486_v49 = vmul.f32 %v1113_v48, %v484_v42  ;;  %v354_v50 = vpop.f32.mrb[9].mxu0 }
 0x181   :  { %v485_v52 = vmul.f32 %v484_v42, %v354_v50 }
 0x182   :  { %v490_v53 = vadd.f32 %v486_v49, %v478_v35  ;;  %v531_v35 = vsub.s32 6, %v1496_v10 }
 0x183   :  { %v489_v54 = vadd.f32 %v485_v52, %v477_v36  ;;  %v1116_v55 = vpop.f32.mrb[10].mxu0 }
 0x184   :  { %v488_v56 = vmul.f32 %v1116_v55, %v484_v42  ;;  %v364_v57 = vpop.f32.mrb[11].mxu0  ;;  %v532_v43 = vrot.slane %v1504_v12, %v531_v35 }
 0x185   :  { %v487_v59 = vmul.f32 %v484_v42, %v364_v57 }
 0x186   :  { %v492_v60 = vadd.f32 %v488_v56, %v480_v46 }
 0x187   :  { %v491_v61 = vadd.f32 %v487_v59, %v479_v47  ;;  %v1119_v62 = vpop.f32.mrb[12].mxu0 }
 0x188   :  { %v498_v63 = vmul.f32 %v1119_v62, %v496_v58  ;;  %v374_v0 = vpop.f32.mrb[13].mxu0 }
 0x189   :  { %v497_v2 = vmul.f32 %v496_v58, %v374_v0 }
 0x18a   :  { %v502_v3 = vadd.f32 %v498_v63, %v490_v53 }
 0x18b   :  { %v501_v4 = vadd.f32 %v497_v2, %v489_v54  ;;  %v1122_v5 = vpop.f32.mrb[14].mxu0 }
 0x18c   :  { %v500_v6 = vmul.f32 %v1122_v5, %v496_v58  ;;  %v384_v7 = vpop.f32.mrb[15].mxu0 }
 0x18d   :  { %v499_v9 = vmul.f32 %v496_v58, %v384_v7 }
 0x18e   :  { %v504_v13 = vadd.f32 %v500_v6, %v492_v60 }
 0x18f   :  { %v503_v14 = vadd.f32 %v499_v9, %v491_v61  ;;  %v1125_v15 = vpop.f32.mrb[16].mxu0 }
 0x190   :  { %v510_v16 = vmul.f32 %v1125_v15, %v508_v8  ;;  %v394_v18 = vpop.f32.mrb[17].mxu0 }
 0x191   :  { %v509_v20 = vmul.f32 %v508_v8, %v394_v18 }
 0x192   :  { %v514_v21 = vadd.f32 %v510_v16, %v502_v3 }
 0x193   :  { %v513_v23 = vadd.f32 %v509_v20, %v501_v4  ;;  %v1128_v24 = vpop.f32.mrb[18].mxu0 }
 0x194   :  { %v512_v25 = vmul.f32 %v1128_v24, %v508_v8  ;;  %v404_v26 = vpop.f32.mrb[19].mxu0  ;;  %v1212_v24 = vld [vmem:[%s1687_s4] ss:$8 sps:$4 sm:$0xff]  }
 0x195   :  { %v511_v28 = vmul.f32 %v508_v8, %v404_v26  ;;  %v1215_v26 = vld [vmem:[%s1687_s4 + $0x10] ss:$8 sps:$4 sm:$0xff]  }
 0x196   :  { %v516_v29 = vadd.f32 %v512_v25, %v504_v13  ;;  %v1213_v25 = vld [vmem:[%s1687_s4 + $0x14] ss:$8 sps:$4 sm:$0xff]  }
 0x197   :  { %v515_v30 = vadd.f32 %v511_v28, %v503_v14  ;;  %v1131_v31 = vpop.f32.mrb[20].mxu0  ;;  %v1218_v28 = vld [vmem:[%s1687_s4 + $0x20] ss:$8 sps:$4 sm:$0xff]  }
 0x198   :  { %v522_v32 = vmul.f32 %v1131_v31, %v520_v27  ;;  %v414_v33 = vpop.f32.mrb[21].mxu0  ;;  %v1256_v31 = vmov 0  }
 0x199   :  { %v521_v36 = vmul.f32 %v520_v27, %v414_v33  ;;  %702 = vmatprep.mubr.bf16.mxu1 %v1256_v31 }
 0x19a   :  { %v526_v37 = vadd.f32 %v522_v32, %v514_v21 }
 0x19b   :  { %v525_v39 = vadd.f32 %v521_v36, %v513_v23  ;;  %v1134_v40 = vpop.f32.mrb[22].mxu0  ;;  %v1210_v23 = vld [vmem:[%s1687_s4 + $0x4] ss:$8 sps:$4 sm:$0xff]  }
 0x19c   :  { %v524_v41 = vmul.f32 %v1134_v40, %v520_v27  ;;  %v424_v42 = vpop.f32.mrb[23].mxu0  ;;  %670 = vmatprep.subr.bf16.mxu1 %v1210_v23 }
 0x19d   :  { %v523_v44 = vmul.f32 %v520_v27, %v424_v42  ;;  %671 = vmatpush1.bf16.msra.mxu1 %v1212_v24  ;;  %v1216_v27 = vld [vmem:[%s1687_s4 + $0x24] ss:$8 sps:$4 sm:$0xff]  }
 0x19e   :  { %v528_v46 = vadd.f32 %v524_v41, %v516_v29  ;;  %672 = vmatprep.subr.bf16.mxu1 %v1213_v25  ;;  %v1219_v29 = vld [vmem:[%s1687_s4 + $0x34] ss:$8 sps:$4 sm:$0xff]  }
 0x19f   :  { %v527_v47 = vadd.f32 %v523_v44, %v515_v30  ;;  %v1137_v48 = vpop.f32.mrb[24].mxu0  ;;  %v1221_v30 = vld [vmem:[%s1687_s4 + $0x30] ss:$8 sps:$4 sm:$0xff]  }
 0x1a0   :  { %v534_v49 = vmul.f32 %v1137_v48, %v532_v43  ;;  %v434_v50 = vpop.f32.mrb[25].mxu0 }
 0x1a1   :  { %v533_v51 = vmul.f32 %v532_v43, %v434_v50  ;;  %673 = vmatpush1.bf16.msra.mxu1 %v1215_v26 }
 0x1a2   :  { %v538_v52 = vadd.f32 %v534_v49, %v526_v37  ;;  %674 = vmatprep.subr.bf16.mxu1 %v1216_v27 }
 0x1a3   :  { %v1140_v53 = vpop.f32.mrb[26].mxu0  ;;  %v537_v54 = vadd.f32 %v533_v51, %v525_v39 }
 0x1a4   :  { %v536_v10 = vmul.f32 %v1140_v53, %v532_v43  ;;  %v444_v55 = vpop.f32.mrb[27].mxu0  ;;  %v545_v56 = vsel %vm541_vm3, %v538_v52, 0.0 }
 0x1a5   :  { %v535_v57 = vmul.f32 %v532_v43, %v444_v55  ;;  %546 = vadd.xlane.f32.xlu1 %v545_v56  ;;  %v542_v58 = vsel %vm541_vm3, %v537_v54, 0.0  ;;  %675 = vmatpush1.bf16.msra.mxu1 %v1218_v28 }
 0x1a6   :  { %543 = vadd.xlane.f32.xlu0 %v542_v58  ;;  %v540_v12 = vadd.f32 %v536_v10, %v528_v46  ;;  %676 = vmatprep.subr.bf16.mxu1 %v1219_v29  ;;  %v56_v46 = vld [vmem:[%s1686_s2 + $0x8] sm:$0xff] }
 0x1a7   :  { %v539_v59 = vadd.f32 %v535_v57, %v527_v47  ;;  %v598_v48 = vrot.slane %v56_v46, %v1499_v11 }
 0x1a8   :  { %v551_v61 = vsel %vm541_vm3, %v540_v12, 0.0 }
 0x1a9   :  { %v548_v60 = vsel %vm541_vm3, %v539_v59, 0.0  ;;  %677 = vmatpush1.bf16.msra.mxu1 %v1221_v30 }
 0x1aa   :  { %549 = vadd.xlane.f32.xlu0 %v548_v60 }
 0x1ae   :  { %552 = vadd.xlane.f32.xlu0 %v551_v61 }
 0x232   :  { %v547_v62 = vpop.xlane.xlu1 %546 }
 0x233   :  { %v556_v63 = vmul.f32 0.015625, %v547_v62  ;;  %v544_v0 = vpop.xlane.xlu0 %543 }
 0x234   :  { %v555_v1 = vmul.f32 0.015625, %v544_v0 }
 0x235   :  { %v560_v2 = vsub.f32 %v538_v52, %v556_v63  ;;  %v606_v52 = vrot.slane %v56_v46, %v1510_v17 }
 0x236   :  { %v559_v3 = vsub.f32 %v537_v54, %v555_v1 }
 0x237   :  { %v550_v4 = vpop.xlane.xlu0 %549  ;;  %v564_v5 = vmul.f32 %v560_v2, %v560_v2 }
 0x238   :  { %v557_v6 = vmul.f32 0.015625, %v550_v4  ;;  %v563_v7 = vmul.f32 %v559_v3, %v559_v3 }
 0x239   :  { %v570_v8 = vsel %vm541_vm3, %v564_v5, 0.0 }
 0x23a   :  { %v561_v9 = vsub.f32 %v539_v59, %v557_v6  ;;  %571 = vadd.xlane.f32.xlu0 %v570_v8  ;;  %v567_v13 = vsel %vm541_vm3, %v563_v7, 0.0 }
 0x23b   :  { %568 = vadd.xlane.f32.xlu1 %v567_v13  ;;  %v553_v14 = vpop.xlane.xlu0 %552 }
 0x23c   :  { %v558_v15 = vmul.f32 0.015625, %v553_v14  ;;  %v565_v16 = vmul.f32 %v561_v9, %v561_v9 }
 0x23e   :  { %v562_v18 = vsub.f32 %v540_v12, %v558_v15  ;;  %v573_v19 = vsel %vm541_vm3, %v565_v16, 0.0 }
 0x23f   :  { %574 = vadd.xlane.f32.xlu1 %v573_v19 }
 0x240   :  { %v566_v20 = vmul.f32 %v562_v18, %v562_v18 }
 0x242   :  { %v576_v21 = vsel %vm541_vm3, %v566_v20, 0.0 }
 0x243   :  { %577 = vadd.xlane.f32.xlu0 %v576_v21 }
 0x2c7   :  { %v572_v32 = vpop.xlane.xlu0 %571 }
 0x2c8   :  { %v580_v33 = vmul.f32 0.015625, %v572_v32  ;;  %v569_v35 = vpop.xlane.xlu1 %568 }
 0x2c9   :  { %v579_v36 = vmul.f32 0.015625, %v569_v35 }
 0x2ca   :  { %v584_v37 = vadd.f32 1e-06, %v580_v33 }
 0x2cb   :  { %v583_v39 = vadd.f32 1e-06, %v579_v36 }
 0x2cc   :  { %1231 = vrsqrt.f32 %v584_v37  ;;  %v575_v40 = vpop.xlane.xlu1 %574 }
 0x2cd   :  { %1233 = vrsqrt.f32 %v583_v39  ;;  %v581_v41 = vmul.f32 0.015625, %v575_v40 }
 0x2cf   :  { %v585_v42 = vadd.f32 1e-06, %v581_v41 }
 0x2d0   :  { %v578_v43 = vpop.xlane.xlu0 %577 }
 0x2d1   :  { %1235 = vrsqrt.f32 %v585_v42  ;;  %v582_v44 = vmul.f32 0.015625, %v578_v43 }
 0x2d3   :  { %v586_v47 = vadd.f32 1e-06, %v582_v44 }
 0x2d5   :  { %1237 = vrsqrt.f32 %v586_v47 }
 0x2d6   :  { %v1232_v49 = vpop.eup %1231 }
 0x2d7   :  { %v1234_v50 = vpop.eup %1233  ;;  %v592_v51 = vmul.f32 %v1232_v49, %v560_v2  ;;  %v1224_v2 = vld [vmem:[%s1687_s4 + $0x44] ss:$8 sps:$4 sm:$0xff]  }
 0x2d8   :  { %v591_v53 = vmul.f32 %v1234_v50, %v559_v3  ;;  %v63_v3 = vld [vmem:[%s1688_s3] sm:$0x3] }
 0x2d9   :  { %v600_v54 = vmul.f32 %v598_v48, %v592_v51  ;;  %v617_v4 = vrot.slane %v63_v3, %v1499_v11  ;;  %v621_v5 = vrot.slane %v63_v3, %v1510_v17 }
 0x2da   :  { %v599_v10 = vmul.f32 %v598_v48, %v591_v53 }
 0x2db   :  { %v1236_v55 = vpop.eup %1235  ;;  %v608_v56 = vadd.f32 %v606_v52, %v600_v54 }
 0x2dc   :  { %v593_v57 = vmul.f32 %v1236_v55, %v561_v9  ;;  %v607_v58 = vadd.f32 %v606_v52, %v599_v10 }
 0x2de   :  { %v611_v12 = vpack.c.bf16 %v608_v56, %v607_v58  ;;  %v601_v61 = vmul.f32 %v598_v48, %v593_v57 }
 0x2df   :  { %v1238_v59 = vpop.eup %1237 }
 0x2e0   :  { %v594_v60 = vmul.f32 %v1238_v59, %v562_v18  ;;  %1023 = vmatmul.mubr.msk.bf16.vlgmr.msra.gmra.mrb[0].mxu1 %vm541_vm3, %v611_v12  ;;  %v609_v63 = vadd.f32 %v606_v52, %v601_v61 }
 0x2e1   :  { %712 = vmatprep.mubr.bf16.mxu1 %v1256_v31 }
 0x2e2   :  { %v602_v62 = vmul.f32 %v598_v48, %v594_v60 }
 0x2e4   :  { %v610_v0 = vadd.f32 %v606_v52, %v602_v62 }
 0x2e6   :  { %v612_v1 = vpack.c.bf16 %v610_v0, %v609_v63 }
 0x2e8   :  { %1024 = vmatmul.mubr.msk.bf16.gmra.mrb[4].mxu1 %vm541_vm3, %v612_v1 }
 0x2e9   :  { %833 = vmatprep.mubr.bf16.mxu1 %v1224_v2 }
 0x3b3   :  { %v704_v6 = vpop.f32.mrb[0].mxu1 }
 0x3b4   :  { %v705_v7 = vadd.f32 %v704_v6, %v617_v4  ;;  %v706_v8 = vpop.f32.mrb[1].mxu1  ;;  %v1257_v6 = vmov 0.0  }
 0x3b5   :  { %v707_v9 = vadd.f32 %v706_v8, %v621_v5  ;;  %v708_v13 = vpop.f32.mrb[2].mxu1  ;;  %v1225_v8 = vld [vmem:[%s1687_s4 + $0x54] ss:$8 sps:$4 sm:$0xff]  }
 0x3b6   :  { %v731_v14 = vmul.f32 0.70710677, %v705_v7  ;;  %v709_v15 = vadd.f32 %v708_v13, %v617_v4  ;;  %v710_v16 = vpop.f32.mrb[3].mxu1  ;;  %v723_v41 = vmul.f32 0.5, %v705_v7  ;;  %v1222_v7 = vld [vmem:[%s1687_s4 + $0x40] ss:$8 sps:$4 sm:$0xff]  }
 0x3b7   :  { %v732_v18 = vmul.f32 0.70710677, %v707_v9  ;;  %v711_v19 = vadd.f32 %v710_v16, %v621_v5  ;;  %v724_v44 = vmul.f32 0.5, %v707_v9  ;;  %v1227_v9 = vld [vmem:[%s1687_s4 + $0x50] ss:$8 sps:$4 sm:$0xff]  }
 0x3b8   :  { %1239 = verf.f32 %v731_v14  ;;  %v733_v20 = vmul.f32 0.70710677, %v709_v15  ;;  %v725_v42 = vmul.f32 0.5, %v709_v15  ;;  %v1228_v13 = vld [vmem:[%s1687_s4 + $0x64] ss:$8 sps:$4 sm:$0xff]   ;;  %v58_v14 = vld [vmem:[%s1686_s2 + $0x18] sm:$0xff] }
 0x3b9   :  { %1241 = verf.f32 %v732_v18  ;;  %v734_v21 = vmul.f32 0.70710677, %v711_v19  ;;  %v726_v46 = vmul.f32 0.5, %v711_v19  ;;  %v59_v15 = vld [vmem:[%s1686_s2 + $0x20] sm:$0xff]  ;;  %v61_v18 = vld [vmem:[%s1686_s2 + $0x30] sm:$0xff]  ;;  %v62_v19 = vld [vmem:[%s1686_s2 + $0x38] sm:$0xff] }
 0x3ba   :  { %1243 = verf.f32 %v733_v20  ;;  %v80_v20 = vpack.c.bf16 %v62_v19, %v61_v18 }
 0x3bb   :  { %1245 = verf.f32 %v734_v21  ;;  %v714_v23 = vpop.f32.mrb[4].mxu1 }
 0x3bc   :  { %v715_v11 = vadd.f32 %v714_v23, %v617_v4  ;;  %v716_v24 = vpop.f32.mrb[5].mxu1 }
 0x3bd   :  { %v717_v17 = vadd.f32 %v716_v24, %v621_v5  ;;  %v718_v25 = vpop.f32.mrb[6].mxu1 }
 0x3be   :  { %v735_v26 = vmul.f32 0.70710677, %v715_v11  ;;  %v719_v27 = vadd.f32 %v718_v25, %v617_v4  ;;  %v720_v28 = vpop.f32.mrb[7].mxu1  ;;  %v727_v12 = vmul.f32 0.5, %v715_v11 }
 0x3bf   :  { %v736_v29 = vmul.f32 0.70710677, %v717_v17  ;;  %v721_v30 = vadd.f32 %v720_v28, %v621_v5  ;;  %v728_v61 = vmul.f32 0.5, %v717_v17 }
 0x3c0   :  { %1247 = verf.f32 %v735_v26  ;;  %v737_v31 = vmul.f32 0.70710677, %v719_v27  ;;  %v729_v59 = vmul.f32 0.5, %v719_v27 }
 0x3c1   :  { %1249 = verf.f32 %v736_v29  ;;  %v738_v32 = vmul.f32 0.70710677, %v721_v30  ;;  %v730_v62 = vmul.f32 0.5, %v721_v30 }
 0x3c2   :  { %v1240_v33 = vpop.eup %1239  ;;  %1251 = verf.f32 %v737_v31 }
 0x3c3   :  { %v1242_v35 = vpop.eup %1241  ;;  %v747_v36 = vadd.f32 1.0, %v1240_v33  ;;  %1253 = verf.f32 %v738_v32  ;;  %v49_v32 = vld [vmem:[%s1685_s1 + $0xe0] sm:$0xff] }
 0x3c4   :  { %v1244_v37 = vpop.eup %1243  ;;  %v748_v39 = vadd.f32 1.0, %v1242_v35 }
 0x3c5   :  { %v1246_v40 = vpop.eup %1245  ;;  %v749_v43 = vadd.f32 1.0, %v1244_v37  ;;  %v755_v48 = vmul.f32 %v747_v36, %v723_v41  ;;  %v50_v37 = vld [vmem:[%s1685_s1 + $0xe8] sm:$0xff] }
 0x3c6   :  { %v750_v47 = vadd.f32 1.0, %v1246_v40  ;;  %v756_v50 = vmul.f32 %v748_v39, %v724_v44  ;;  %v51_v44 = vld [vmem:[%s1685_s1 + $0xf0] sm:$0xff] }
 0x3c7   :  { %v757_v49 = vmul.f32 %v749_v43, %v725_v42 }
 0x3c8   :  { %v758_v51 = vmul.f32 %v750_v47, %v726_v46 }
 0x3c9   :  { %v767_v52 = vpack.c.bf16 %v757_v49, %v755_v48  ;;  %v52_v49 = vld [vmem:[%s1685_s1 + $0xf8] sm:$0xff] }
 0x3ca   :  { %v1248_v53 = vpop.eup %1247  ;;  %v768_v54 = vpack.c.bf16 %v758_v51, %v756_v50 }
 0x3cb   :  { %v1250_v10 = vpop.eup %1249  ;;  %v751_v55 = vadd.f32 1.0, %v1248_v53 }
 0x3cc   :  { %v1252_v56 = vpop.eup %1251  ;;  %v752_v57 = vadd.f32 1.0, %v1250_v10  ;;  %801 = vmatprep.subr.bf16.mxu1 %v768_v54  ;;  %v53_v10 = vld [vmem:[%s1685_s1 + $0x100] sm:$0xff] }
 0x3cd   :  { %v1254_v58 = vpop.eup %1253  ;;  %v753_v60 = vadd.f32 1.0, %v1252_v56  ;;  %802 = vmatpush1.bf16.xpose.msra.mxu1 %v767_v52  ;;  %v759_v0 = vmul.f32 %v751_v55, %v727_v12 }
 0x3ce   :  { %v754_v63 = vadd.f32 1.0, %v1254_v58  ;;  %v760_v2 = vmul.f32 %v752_v57, %v728_v61  ;;  %v54_v58 = vld [vmem:[%s1685_s1 + $0x108] sm:$0xff] }
 0x3cf   :  { %v761_v1 = vmul.f32 %v753_v60, %v729_v59 }
 0x3d0   :  { %v762_v3 = vmul.f32 %v754_v63, %v730_v62 }
 0x3d1   :  { %v769_v4 = vpack.c.bf16 %v761_v1, %v759_v0 }
 0x3d2   :  { %v770_v5 = vpack.c.bf16 %v762_v3, %v760_v2 }
 0x3d4   :  { %803 = vmatprep.subr.bf16.mxu1 %v770_v5 }
 0x3d5   :  { %804 = vmatpush1.bf16.xpose.msra.mxu1 %v769_v4 }
 0x3d6   :  { %1141 = vmatprep.subr.bf16.mxu1 %v1257_v6 }
 0x3dc   :  { %834 = vmatmul.mubr.bf16.vlgmr.msra.gmra.mrb[8].mxu1 %v1222_v7 }
 0x3dd   :  { %1142 = vmatpush3.bf16.msra.mxu1 %v1332_v22  ;;  %841 = vmatprep.mubr.bf16.mxu1 %v1225_v8  ;;  %v1230_v22 = vld [vmem:[%s1687_s4 + $0x60] ss:$8 sps:$4 sm:$0xff]  }
 0x3de   :  { %1143 = vmatprep.subr.bf16.mxu1 %v1257_v6 }
 0x3e1   :  { %1144 = vmatpush3.bf16.msra.mxu1 %v1354_v34  ;;  %v57_v34 = vld [vmem:[%s1686_s2 + $0x10] sm:$0xff] }
 0x3e2   :  { %1145 = vmatprep.subr.bf16.mxu1 %v1257_v6 }
 0x3e4   :  { %842 = vmatmul.mubr.bf16.gmra.mrb[12].mxu1 %v1227_v9 }
 0x3e5   :  { %1146 = vmatpush3.bf16.msra.mxu1 %v1361_v38  ;;  %849 = vmatprep.mubr.bf16.mxu1 %v1228_v13  ;;  %v78_v38 = vpack.c.bf16 %v58_v14, %v57_v34 }
 0x3e6   :  { %1147 = vmatprep.subr.bf16.mxu1 %v1257_v6 }
 0x3e9   :  { %1148 = vmatpush3.bf16.msra.mxu1 %v1377_v45  ;;  %v60_v45 = vld [vmem:[%s1686_s2 + $0x28] sm:$0xff] }
 0x3ea   :  { %v79_v16 = vpack.c.bf16 %v60_v45, %v59_v15 }
 0x3ec   :  { %850 = vmatmul.mubr.bf16.gmra.mrb[16].mxu1 %v1230_v22 }
 0x3ed   :  { %1149 = vmatprep.mubr.msk.bf16.mxu1 %vm1258_vm4, %v1257_v6 }
 0x3f4   :  { %1150 = vmatmul.mubr.msk.bf16.vlgmr.msra.gmra.mrb[20].mxu1 %vm541_vm3, %v78_v38 }
 0x3f5   :  { %1153 = vmatprep.mubr.msk.bf16.mxu1 %vm1258_vm4, %v1257_v6 }
 0x3fc   :  { %1154 = vmatmul.mubr.msk.bf16.gmra.mrb[24].mxu1 %vm541_vm3, %v79_v16 }
 0x3fd   :  { %1157 = vmatprep.mubr.msk.bf16.mxu1 %vm1258_vm4, %v1257_v6 }
 0x404   :  { %1158 = vmatmul.mubr.msk.bf16.gmra.mrb[28].mxu1 %vm541_vm3, %v80_v20 }
 0x4af   :  { %v835_v21 = vpop.f32.mrb[8].mxu1 }
 0x4b0   :  { %v837_v23 = vpop.f32.mrb[9].mxu1 }
 0x4b1   :  { %v838_v11 = vpop.f32.mrb[10].mxu1 }
 0x4b2   :  { %v840_v24 = vpop.f32.mrb[11].mxu1 }
 0x4b7   :  { %v843_v17 = vpop.f32.mrb[12].mxu1 }
 0x4b8   :  { %v845_v25 = vpop.f32.mrb[13].mxu1 }
 0x4b9   :  { %v846_v26 = vpop.f32.mrb[14].mxu1 }
 0x4ba   :  { %v848_v27 = vpop.f32.mrb[15].mxu1 }
 0x4bf   :  { %v851_v28 = vpop.f32.mrb[16].mxu1 }
 0x4c0   :  { %v853_v29 = vpop.f32.mrb[17].mxu1 }
 0x4c1   :  { %v854_v30 = vpop.f32.mrb[18].mxu1 }
 0x4c2   :  { %v856_v31 = vpop.f32.mrb[19].mxu1 }
 0x4c7   :  { %v901_v33 = vpop.f32.mrb[20].mxu1 }
 0x4c8   :  { %v902_v35 = vadd.f32 %v901_v33, %v835_v21  ;;  %v1151_v36 = vpop.f32.mrb[21].mxu1 }
 0x4c9   :  { %v904_v39 = vpop.f32.mrb[22].mxu1 }
 0x4ca   :  { %v924_v40 = vadd.f32 %v902_v35, %v49_v32  ;;  %v905_v41 = vadd.f32 %v904_v39, %v838_v11  ;;  %v1152_v42 = vpop.f32.mrb[23].mxu1 }
 0x4cc   :  { %930 = vst.msk [vmem:[%s1689_s5] sm:$0xff] %vm130_vm1, %v924_v40  ;;  %v925_v43 = vadd.f32 %v905_v41, %v50_v37  ;;  %942 = vrot.lane.b32.xlu1 %v924_v40, %s1259_s27 }
 0x4ce   :  { %931 = vst.msk [vmem:[%s1689_s5 + $0x8] sm:$0xff] %vm130_vm1, %v925_v43  ;;  %944 = vrot.lane.b32.xlu0 %v925_v43, %s1259_s27 }
 0x4cf   :  { %v909_v46 = vpop.f32.mrb[24].mxu1 }
 0x4d0   :  { %v910_v47 = vadd.f32 %v909_v46, %v843_v17  ;;  %v1155_v48 = vpop.f32.mrb[25].mxu1 }
 0x4d1   :  { %v912_v50 = vpop.f32.mrb[26].mxu1 }
 0x4d2   :  { %v926_v51 = vadd.f32 %v910_v47, %v51_v44  ;;  %v913_v52 = vadd.f32 %v912_v50, %v846_v26  ;;  %v1156_v53 = vpop.f32.mrb[27].mxu1 }
 0x4d4   :  { %932 = vst.msk [vmem:[%s1689_s5 + $0x10] sm:$0xff] %vm130_vm1, %v926_v51  ;;  %v927_v54 = vadd.f32 %v913_v52, %v52_v49  ;;  %946 = vrot.lane.b32.xlu1 %v926_v51, %s1259_s27 }
 0x4d6   :  { %933 = vst.msk [vmem:[%s1689_s5 + $0x18] sm:$0xff] %vm130_vm1, %v927_v54 }
 0x4d7   :  { %v917_v55 = vpop.f32.mrb[28].mxu1 }
 0x4d8   :  { %v918_v56 = vadd.f32 %v917_v55, %v851_v28  ;;  %948 = vrot.lane.b32.xlu1 %v927_v54, %s1259_s27  ;;  %v1159_v57 = vpop.f32.mrb[29].mxu1 }
 0x4d9   :  { %v920_v12 = vpop.f32.mrb[30].mxu1 }
 0x4da   :  { %v928_v59 = vadd.f32 %v918_v56, %v53_v10  ;;  %v921_v60 = vadd.f32 %v920_v12, %v854_v30  ;;  %v1160_v61 = vpop.f32.mrb[31].mxu1 }
 0x4dc   :  { %934 = vst.msk [vmem:[%s1689_s5 + $0x20] sm:$0xff] %vm130_vm1, %v928_v59  ;;  %v929_v62 = vadd.f32 %v921_v60, %v54_v58  ;;  %950 = vrot.lane.b32.xlu0 %v928_v59, %s1259_s27 }
 0x4de   :  { %935 = vst.msk [vmem:[%s1689_s5 + $0x28] sm:$0xff] %vm130_vm1, %v929_v62  ;;  %952 = vrot.lane.b32.xlu1 %v929_v62, %s1259_s27 }
 0x53e   :  { %v943_v63 = vpop.permute.xlu1 %942 }
 0x53f   :  { %1034 = vst.msk [vmem:[%s1689_s5 + $0x30] sm:$0xff] %vm130_vm1, %v943_v63 }
 0x540   :  { %v945_v0 = vpop.permute.xlu0 %944 }
 0x541   :  { %1035 = vst.msk [vmem:[%s1689_s5 + $0x38] sm:$0xff] %vm130_vm1, %v945_v0 }
 0x546   :  { %v947_v1 = vpop.permute.xlu1 %946 }
 0x547   :  { %1036 = vst.msk [vmem:[%s1689_s5 + $0x40] sm:$0xff] %vm130_vm1, %v947_v1 }
 0x54a   :  { %v949_v2 = vpop.permute.xlu1 %948 }
 0x54b   :  { %1037 = vst.msk [vmem:[%s1689_s5 + $0x48] sm:$0xff] %vm130_vm1, %v949_v2 }
 0x54e   :  { %v951_v3 = vpop.permute.xlu0 %950 }
 0x54f   :  { %1038 = vst.msk [vmem:[%s1689_s5 + $0x50] sm:$0xff] %vm130_vm1, %v951_v3 }
 0x550   :  { %v953_v4 = vpop.permute.xlu1 %952 }
 0x551   :  { %1039 = vst.msk [vmem:[%s1689_s5 + $0x58] sm:$0xff] %vm130_vm1, %v953_v4 }

</bundles_post_ra>
